<compile_context>
chip_gen: v7x
topology: tpu7x:2x2x1
jax: 0.10.0
libtpu: 0.0.40
codegen_flags: <defaults>
</compile_context>

<pallas_src>
import functools

import jax
import jax.numpy as jnp
from jax.experimental import pallas as pl
from jax.experimental.pallas import tpu as pltpu

Nl = 8           # neighbors per point (reference uses 30)
Ns = 8           # fictitious sources per point (reference uses 15)
R_INIT = 5.0     # source-circle radius scale
_EPS = 1e-30     # guard against log(0) if a point coincides with a source

_VMEM_LIMIT = 32 * 1024 * 1024        # explicit budget (v7x scoped default)
_LANE_TARGET_BYTES = 1 << 20          # ~1 MiB per grid block
_LANE_SINGLE_BLOCK_BYTES = 2 << 20    # below this: one full-extent block


def _round_up(n, m):
    return ((n + m - 1) // m) * m


def _lane_tiling(n, bytes_per_col):
    """Pick (lane_tile, padded_n) for a (features, N) kernel.

    Small problems: one full-extent block (no (.,128) constraint, no padding).
    Large problems: ~1 MiB blocks (>=2 blocks -> v7x 2-TensorCore sharding).
    """
    total = n * bytes_per_col
    if total <= _LANE_SINGLE_BLOCK_BYTES:
        return n, n
    tile = max(128, (_LANE_TARGET_BYTES // bytes_per_col) // 128 * 128)
    return tile, _round_up(n, tile)


# ---------------- Pallas kernel 1: MFS log-distance matrices ----------------
def _mfs_kernel(ns, nl, ns8, off_cx, off_cy, off_tx, off_ty, slab_ref, out_ref):
    if ns != ns8:                       # static: only when Ns is not 8-aligned
        out_ref[...] = jnp.zeros_like(out_ref)
    xx = slab_ref[0:1, :]               # (1, T)
    xy = slab_ref[1:2, :]
    cx = slab_ref[off_cx:off_cx + ns, :]    # (Ns, T)
    cy = slab_ref[off_cy:off_cy + ns, :]
    # mfs[s, t] = log ||x[t] - c[t, s]|| == 0.5 * log(d2)   (one EUP op)
    d2 = (xx - cx) ** 2 + (xy - cy) ** 2
    out_ref[0:ns, :] = 0.5 * jnp.log(jnp.maximum(d2, _EPS))
    # mfs1[l*ns8 + s, t] = log ||tpx[t, l] - c[t, s]||  -- direct sublane-aligned
    # row-block stores, no concatenate, full-lane (8, T) log streams.
    for l in range(nl):
        tx = slab_ref[off_tx + l:off_tx + l + 1, :]
        ty = slab_ref[off_ty + l:off_ty + l + 1, :]
        d2l = (tx - cx) ** 2 + (ty - cy) ** 2
        r0 = (l + 1) * ns8
        out_ref[r0:r0 + ns, :] = 0.5 * jnp.log(jnp.maximum(d2l, _EPS))


def mfs_pallas(xx, xy, cx, cy, tx, ty):
    """Inputs are transposed field slabs: xx,xy (1,N); cx,cy (Ns,N); tx,ty (Nl,N)."""
    ns, n = cx.shape
    nl = tx.shape[0]
    ns8 = _round_up(ns, 8)
    nl8 = _round_up(nl, 8)
    off_cx = 8
    off_cy = 8 + ns8
    off_tx = 8 + 2 * ns8
    off_ty = 8 + 2 * ns8 + nl8
    w_in = 8 + 2 * ns8 + 2 * nl8
    w_out = (nl + 1) * ns8

    def pad_rows(a, r):
        return jnp.pad(a, ((0, r - a.shape[0]), (0, 0)))

    # One (w_in, N) slab, field starts aligned to multiples of 8 sublanes.
    slab = jnp.concatenate([
        pad_rows(jnp.concatenate([xx, xy], axis=0), 8),
        pad_rows(cx, ns8), pad_rows(cy, ns8),
        pad_rows(tx, nl8), pad_rows(ty, nl8),
    ], axis=0).astype(jnp.float32)

    tile, n_pad = _lane_tiling(n, (w_in + w_out) * 4)
    if n_pad != n:
        slab = jnp.pad(slab, ((0, 0), (0, n_pad - n)), mode="edge")

    out = pl.pallas_call(
        functools.partial(_mfs_kernel, ns, nl, ns8, off_cx, off_cy, off_tx, off_ty),
        out_shape=jax.ShapeDtypeStruct((w_out, n_pad), jnp.float32),
        grid=(n_pad // tile,),
        in_specs=[pl.BlockSpec((w_in, tile), lambda i: (0, i))],
        out_specs=pl.BlockSpec((w_out, tile), lambda i: (0, i)),
        compiler_params=pltpu.CompilerParams(
            dimension_semantics=("parallel",),
            vmem_limit_bytes=_VMEM_LIMIT),
    )(slab)

    mfs_T = out[:ns, :n]                                       # (Ns, N)
    mfs1 = out[ns8:(nl + 1) * ns8, :n].reshape(nl, ns8, n)[:, :ns, :]
    mfs1 = jnp.transpose(mfs1, (2, 0, 1))                      # (N, Nl, Ns) glue
    return mfs_T, mfs1


# ------------- Pallas kernel 2: batched coefficient contraction -------------
def _coeff_kernel(ns, nl8, mfs_ref, pinv_ref, w_ref):
    # w[l, t] = sum_s mfs[s, t] * pinv[s*nl8 + l, t]  (s on sublanes, aligned
    # nl8 row groups -> pure VPU mul-adds, lane-dense output).
    acc = mfs_ref[0:1, :] * pinv_ref[0:nl8, :]
    for s in range(1, ns):
        acc = acc + mfs_ref[s:s + 1, :] * pinv_ref[s * nl8:(s + 1) * nl8, :]
    w_ref[...] = acc


def coeff_pallas(mfs_T, pinv):
    """mfs_T: (Ns, N); pinv: (N, Ns, Nl)  ->  w_T: (Nl, N)."""
    ns, n = mfs_T.shape
    nl = pinv.shape[2]
    nl8 = _round_up(nl, 8)
    if nl8 != nl:
        pinv = jnp.pad(pinv, ((0, 0), (0, 0), (0, nl8 - nl)))
    pinv_T = pinv.reshape(n, ns * nl8).T.astype(jnp.float32)   # (Ns*nl8, N), s-major
    mfs_T = mfs_T.astype(jnp.float32)

    tile, n_pad = _lane_tiling(n, (ns + ns * nl8 + nl8) * 4)
    if n_pad != n:
        mfs_T = jnp.pad(mfs_T, ((0, 0), (0, n_pad - n)))
        pinv_T = jnp.pad(pinv_T, ((0, 0), (0, n_pad - n)))

    w_T = pl.pallas_call(
        functools.partial(_coeff_kernel, ns, nl8),
        out_shape=jax.ShapeDtypeStruct((nl8, n_pad), jnp.float32),
        grid=(n_pad // tile,),
        in_specs=[pl.BlockSpec((ns, tile), lambda i: (0, i)),
                  pl.BlockSpec((ns * nl8, tile), lambda i: (0, i))],
        out_specs=pl.BlockSpec((nl8, tile), lambda i: (0, i)),
        compiler_params=pltpu.CompilerParams(
            dimension_semantics=("parallel",),
            vmem_limit_bytes=_VMEM_LIMIT),
    )(mfs_T, pinv_T)
    return w_T[:nl, :n]                                        # (Nl, N)


# -------- Pallas kernel 3: sparse forward matvec  f = (I + A0) @ u ----------
def _spmv_kernel(coef_ref, ug_ref, f_ref):
    # f[0, t] = sum_r coef[r, t] * u[idx[r, t]]
    #         = u[t] - sum_l w[t, l] * u[idx[t, l]]
    f_ref[...] = jnp.sum(coef_ref[...] * ug_ref[...], axis=0, keepdims=True)


def spmv_pallas(coef, ug, tile):
    """coef, ug: (Nl+1, N_pad) prebuilt/pre-padded; returns (1, N_pad)."""
    r, n_pad = coef.shape
    return pl.pallas_call(
        _spmv_kernel,
        out_shape=jax.ShapeDtypeStruct((1, n_pad), jnp.float32),
        grid=(n_pad // tile,),
        in_specs=[pl.BlockSpec((r, tile), lambda i: (0, i)),
                  pl.BlockSpec((r, tile), lambda i: (0, i))],
        out_specs=pl.BlockSpec((1, tile), lambda i: (0, i)),
        compiler_params=pltpu.CompilerParams(
            dimension_semantics=("parallel",),
            vmem_limit_bytes=_VMEM_LIMIT),
    )(coef.astype(jnp.float32), ug.astype(jnp.float32))


# ------------------------------- LMFSNN model --------------------------------
class LMFSNN:
    def __init__(self, nl, r, ns, data, key):
        data_in, data_bound = data
        self.centers = jnp.concatenate([data_in, data_bound], axis=0)
        self.len_data = data_in.shape[0]
        self.Nl = nl
        self.R_init = r
        self.hidden_dim = self.centers.shape[0]
        self.Ns = ns
        # torch.nn.init.normal_(u, mean=0.0, std=0.01)
        self.u = 0.01 * jax.random.normal(key, (self.hidden_dim, 1), jnp.float32)
        self.R = jnp.ones((self.hidden_dim, 1), jnp.float32) * r
        self.RR = jnp.ones((self.hidden_dim, 1), jnp.float32) * r
        self.f_A = None
        self.w = None
        self.tpx = None
        self.sinta = None
        self.maxdm = None
        self.rxy = None
        self.A_index_all = None
        self.i = 0
        # per-step sparse-matvec state (built once)
        self._n_pts = None
        self._spmv_tile = None
        self._spmv_npad = None
        self._gather_idx = None
        self._coef = None

    # KDTree k-NN setup (glue, plain JAX): query k=Nl+1, drop self, sort ids.
    # (Assumes x == centers, as in the reference driver.)
    def local_activate(self, x):
        d2 = jnp.sum((x[:, None, :] - self.centers[None, :, :]) ** 2, axis=-1)
        n = x.shape[0]
        d2 = d2.at[jnp.arange(n), jnp.arange(n)].set(jnp.inf)   # exclude self
        _, idx = jax.lax.top_k(-d2, self.Nl)
        self.A_index_all = jnp.sort(idx, axis=-1)               # (N, Nl)
        # Prebuilt, pre-padded gather table for the per-step sparse matvec:
        # rows 0..Nl-1 = neighbor ids, row Nl = self id (identity diagonal).
        self._n_pts = n
        self._spmv_tile, self._spmv_npad = _lane_tiling(n, (2 * (self.Nl + 1) + 1) * 4)
        idx_all = jnp.concatenate(
            [self.A_index_all.T,
             jnp.arange(n, dtype=self.A_index_all.dtype)[None, :]], axis=0)
        self._gather_idx = jnp.pad(idx_all, ((0, 0), (0, self._spmv_npad - n)))

    def get_dist(self, x):
        n = self.A_index_all.shape[0]
        self.tpx = self.centers[self.A_index_all]               # (N, Nl, 2)
        self.sinta = (jnp.arange(self.Ns, dtype=jnp.float32) / self.Ns) * 2.0 * jnp.pi
        self.maxdm = jnp.max(
            jnp.sqrt(jnp.sum((x[:n, None, :] - self.tpx) ** 2, axis=-1)))
        self.rxy = jnp.stack([jnp.cos(self.sinta), jnp.sin(self.sinta)], axis=-1)  # (Ns, 2)

    def get_A(self, x):
        if self.sinta is None:
            self.get_dist(x)
        idx = self.A_index_all
        n = idx.shape[0]
        h = self.hidden_dim

        # Fictitious source circles, built directly in (feature, point) layout:
        # c[n, s, :] = centers[n] + R[n]*maxdm*rxy[s]
        scale = (self.R[:n, 0] * self.maxdm)[None, :]            # (1, N)
        cx_T = self.centers[:n, 0][None, :] + self.rxy[:, 0][:, None] * scale  # (Ns, N)
        cy_T = self.centers[:n, 1][None, :] + self.rxy[:, 1][:, None] * scale
        tx_T = self.tpx[..., 0].T                                # (Nl, N)
        ty_T = self.tpx[..., 1].T
        xx = x[:n, 0][None, :]
        xy = x[:n, 1][None, :]

        # Pallas: MFS log-distance matrices (lane-dense, packed slab in/out)
        mfs_T, mfs1 = mfs_pallas(xx, xy, cx_T, cy_T, tx_T, ty_T)  # (Ns,N), (N,Nl,Ns)

        # TODO(synk): the reference's rank-bucketed float64 SVD pinv (atol=1e-8)
        # has no clean Pallas equivalent; jnp.linalg.pinv is the functional match.
        mfs_pinv = jnp.linalg.pinv(mfs1)                          # (N, Ns, Nl)

        # Pallas: batched coefficient contraction  w[n, l] = sum_s mfs[n,s]*pinv[n,s,l]
        w_T = coeff_pallas(mfs_T, mfs_pinv)                       # (Nl, N)
        w = w_T.T                                                 # (N, Nl)

        # Per-step sparse-matvec coefficient slab, padded ONCE per generation:
        coef = jnp.concatenate([-w_T, jnp.ones((1, n), jnp.float32)], axis=0)
        self._coef = jnp.pad(coef, ((0, 0), (0, self._spmv_npad - n)))

        # Dense f_A (module output): single fused scatter (off-diag -w + diag 1),
        # no eye materialization, no extra add pass.
        rows = jnp.repeat(jnp.arange(n), self.Nl)
        cols = idx.reshape(-1)
        diag = jnp.arange(h)
        all_rows = jnp.concatenate([rows, diag])
        all_cols = jnp.concatenate([cols, diag])
        all_vals = jnp.concatenate([-w.reshape(-1), jnp.ones((h,), jnp.float32)])
        f_A = jnp.zeros((h, h), jnp.float32).at[all_rows, all_cols].add(all_vals)
        return f_A, w

    def forward(self, x, t):
        if (t % 5 == 0) or (self.f_A is None):
            self.f_A, self.w = self.get_A(x)
            self.RR = self.R
            self.i += 1
        n = self._n_pts
        # Per-step path: one XLA gather of the (Nl+1, N_pad) needed u rows plus
        # one lane-dense Pallas reduce.  No pads/concats/relayouts per step.
        ug = self.u[self._gather_idx, 0]                          # (Nl+1, N_pad)
        f_T = spmv_pallas(self._coef, ug, self._spmv_tile)        # (1, N_pad)
        f_head = f_T[0, :n].reshape(n, 1)
        if n == self.hidden_dim:
            f = f_head
        else:
            f = jnp.concatenate([f_head, self.u[n:]], axis=0)
        return (jnp.squeeze(f), jnp.squeeze(self.u), jnp.squeeze(self.f_A))


# -------------------------------- demo driver --------------------------------
if __name__ == "__main__":
    key = jax.random.PRNGKey(0)
    k_in, k_u = jax.random.split(key)

    n_in, n_bd = 48, 16
    data_in = jax.random.uniform(k_in, (n_in, 2), jnp.float32, -1.0, 1.0)

    # boundary points on the square [-1, 1]^2
    s = jnp.linspace(0.0, 1.0, n_bd // 4, endpoint=False)
    ones = jnp.ones_like(s)
    data_bound = jnp.concatenate([
        jnp.stack([-1.0 + 2.0 * s, -ones], axis=-1),
        jnp.stack([ones, -1.0 + 2.0 * s], axis=-1),
        jnp.stack([1.0 - 2.0 * s, ones], axis=-1),
        jnp.stack([-ones, 1.0 - 2.0 * s], axis=-1),
    ], axis=0)

    model = LMFSNN(Nl, R_INIT, Ns, (data_in, data_bound), key=k_u)
    x = model.centers                        # evaluation points == collocation points
    model.local_activate(x)                  # neighbor setup (KDTree equivalent)

    f, u, f_A = model.forward(x, t=0)        # builds f_A / w, sparse matvec
    f1, _, _ = model.forward(x, t=1)         # reuse path (no rebuild)
    jax.block_until_ready((f, u, f_A, f1))

    assert f.shape == (model.hidden_dim,)
    assert u.shape == (model.hidden_dim,)
    assert f_A.shape == (model.hidden_dim, model.hidden_dim)
    assert bool(jnp.all(jnp.isfinite(f))) and bool(jnp.all(jnp.isfinite(f_A)))
    assert bool(jnp.all(jnp.isfinite(f1)))

    # Sparse Pallas matvec must match the dense reference product f_A @ u.
    f_dense = (f_A @ model.u)[:, 0]
    err = float(jnp.max(jnp.abs(f - f_dense)))
    tol_scale = 1.0 + float(jnp.max(jnp.abs(model.w))) * float(jnp.max(jnp.abs(model.u)))
    assert err <= 1e-3 * tol_scale, (err, tol_scale)

    print("KERNEL_OK")
</pallas_src>

<mosaic_0001>
module attributes {stable_mosaic.version = 11 : i64} {
  func.func @_mfs_kernel(%arg0: i32, %arg1: memref<40x64xf32, #tpu.memory_space<vmem>>, %arg2: memref<72x64xf32, #tpu.memory_space<vmem>>) attributes {dimension_semantics = [#tpu.dimension_semantics<parallel>], iteration_bounds = array<i64: 1>, scalar_prefetch = 0 : i64, scratch_operands = 0 : i64, tpu.core_type = #tpu.core_type<tc>, window_params = [{transform_indices = @transform_0, window_bounds = array<i64: 40, 64>}, {transform_indices = @transform_1, window_bounds = array<i64: 72, 64>}]} {
    %c0 = arith.constant 0 : index
    %c0_0 = arith.constant 0 : index
    %0 = vector.load %arg1[%c0, %c0_0] : memref<40x64xf32, #tpu.memory_space<vmem>>, vector<1x64xf32>
    %c1 = arith.constant 1 : index
    %c0_1 = arith.constant 0 : index
    %1 = vector.load %arg1[%c1, %c0_1] : memref<40x64xf32, #tpu.memory_space<vmem>>, vector<1x64xf32>
    %c8 = arith.constant 8 : index
    %c0_2 = arith.constant 0 : index
    %2 = vector.load %arg1[%c8, %c0_2] : memref<40x64xf32, #tpu.memory_space<vmem>>, vector<8x64xf32>
    %c16 = arith.constant 16 : index
    %c0_3 = arith.constant 0 : index
    %3 = vector.load %arg1[%c16, %c0_3] : memref<40x64xf32, #tpu.memory_space<vmem>>, vector<8x64xf32>
    %4 = vector.broadcast %0 : vector<1x64xf32> to vector<8x64xf32>
    %5 = arith.subf %4, %2 : vector<8x64xf32>
    %6 = arith.mulf %5, %5 : vector<8x64xf32>
    %7 = vector.broadcast %1 : vector<1x64xf32> to vector<8x64xf32>
    %8 = arith.subf %7, %3 : vector<8x64xf32>
    %9 = arith.mulf %8, %8 : vector<8x64xf32>
    %10 = arith.addf %6, %9 : vector<8x64xf32>
    %cst = arith.constant 1.000000e-30 : f32
    %11 = vector.broadcast %cst : f32 to vector<8x64xf32>
    %12 = arith.maximumf %10, %11 : vector<8x64xf32>
    %13 = math.log %12 : vector<8x64xf32>
    %cst_4 = arith.constant 5.000000e-01 : f32
    %14 = vector.broadcast %cst_4 : f32 to vector<8x64xf32>
    %15 = arith.mulf %14, %13 : vector<8x64xf32>
    %c0_5 = arith.constant 0 : index
    %c0_6 = arith.constant 0 : index
    %16 = vector.load %arg2[%c0_5, %c0_6] : memref<72x64xf32, #tpu.memory_space<vmem>>, vector<8x64xf32>
    tpu.vector_store %arg2[%c0_5, %c0_6], %15 {strides = array<i32>} : memref<72x64xf32, #tpu.memory_space<vmem>>, vector<8x64xf32>,
    %c24 = arith.constant 24 : index
    %c0_7 = arith.constant 0 : index
    %17 = vector.load %arg1[%c24, %c0_7] : memref<40x64xf32, #tpu.memory_space<vmem>>, vector<1x64xf32>
    %c32 = arith.constant 32 : index
    %c0_8 = arith.constant 0 : index
    %18 = vector.load %arg1[%c32, %c0_8] : memref<40x64xf32, #tpu.memory_space<vmem>>, vector<1x64xf32>
    %19 = vector.broadcast %17 : vector<1x64xf32> to vector<8x64xf32>
    %20 = arith.subf %19, %2 : vector<8x64xf32>
    %21 = arith.mulf %20, %20 : vector<8x64xf32>
    %22 = vector.broadcast %18 : vector<1x64xf32> to vector<8x64xf32>
    %23 = arith.subf %22, %3 : vector<8x64xf32>
    %24 = arith.mulf %23, %23 : vector<8x64xf32>
    %25 = arith.addf %21, %24 : vector<8x64xf32>
    %cst_9 = arith.constant 1.000000e-30 : f32
    %26 = vector.broadcast %cst_9 : f32 to vector<8x64xf32>
    %27 = arith.maximumf %25, %26 : vector<8x64xf32>
    %28 = math.log %27 : vector<8x64xf32>
    %cst_10 = arith.constant 5.000000e-01 : f32
    %29 = vector.broadcast %cst_10 : f32 to vector<8x64xf32>
    %30 = arith.mulf %29, %28 : vector<8x64xf32>
    %c8_11 = arith.constant 8 : index
    %c0_12 = arith.constant 0 : index
    %31 = vector.load %arg2[%c8_11, %c0_12] : memref<72x64xf32, #tpu.memory_space<vmem>>, vector<8x64xf32>
    tpu.vector_store %arg2[%c8_11, %c0_12], %30 {strides = array<i32>} : memref<72x64xf32, #tpu.memory_space<vmem>>, vector<8x64xf32>,
    %c25 = arith.constant 25 : index
    %c0_13 = arith.constant 0 : index
    %32 = vector.load %arg1[%c25, %c0_13] : memref<40x64xf32, #tpu.memory_space<vmem>>, vector<1x64xf32>
    %c33 = arith.constant 33 : index
    %c0_14 = arith.constant 0 : index
    %33 = vector.load %arg1[%c33, %c0_14] : memref<40x64xf32, #tpu.memory_space<vmem>>, vector<1x64xf32>
    %34 = vector.broadcast %32 : vector<1x64xf32> to vector<8x64xf32>
    %35 = arith.subf %34, %2 : vector<8x64xf32>
    %36 = arith.mulf %35, %35 : vector<8x64xf32>
    %37 = vector.broadcast %33 : vector<1x64xf32> to vector<8x64xf32>
    %38 = arith.subf %37, %3 : vector<8x64xf32>
    %39 = arith.mulf %38, %38 : vector<8x64xf32>
    %40 = arith.addf %36, %39 : vector<8x64xf32>
    %cst_15 = arith.constant 1.000000e-30 : f32
    %41 = vector.broadcast %cst_15 : f32 to vector<8x64xf32>
    %42 = arith.maximumf %40, %41 : vector<8x64xf32>
    %43 = math.log %42 : vector<8x64xf32>
    %cst_16 = arith.constant 5.000000e-01 : f32
    %44 = vector.broadcast %cst_16 : f32 to vector<8x64xf32>
    %45 = arith.mulf %44, %43 : vector<8x64xf32>
    %c16_17 = arith.constant 16 : index
    %c0_18 = arith.constant 0 : index
    %46 = vector.load %arg2[%c16_17, %c0_18] : memref<72x64xf32, #tpu.memory_space<vmem>>, vector<8x64xf32>
    tpu.vector_store %arg2[%c16_17, %c0_18], %45 {strides = array<i32>} : memref<72x64xf32, #tpu.memory_space<vmem>>, vector<8x64xf32>,
    %c26 = arith.constant 26 : index
    %c0_19 = arith.constant 0 : index
    %47 = vector.load %arg1[%c26, %c0_19] : memref<40x64xf32, #tpu.memory_space<vmem>>, vector<1x64xf32>
    %c34 = arith.constant 34 : index
    %c0_20 = arith.constant 0 : index
    %48 = vector.load %arg1[%c34, %c0_20] : memref<40x64xf32, #tpu.memory_space<vmem>>, vector<1x64xf32>
    %49 = vector.broadcast %47 : vector<1x64xf32> to vector<8x64xf32>
    %50 = arith.subf %49, %2 : vector<8x64xf32>
    %51 = arith.mulf %50, %50 : vector<8x64xf32>
    %52 = vector.broadcast %48 : vector<1x64xf32> to vector<8x64xf32>
    %53 = arith.subf %52, %3 : vector<8x64xf32>
    %54 = arith.mulf %53, %53 : vector<8x64xf32>
    %55 = arith.addf %51, %54 : vector<8x64xf32>
    %cst_21 = arith.constant 1.000000e-30 : f32
    %56 = vector.broadcast %cst_21 : f32 to vector<8x64xf32>
    %57 = arith.maximumf %55, %56 : vector<8x64xf32>
    %58 = math.log %57 : vector<8x64xf32>
    %cst_22 = arith.constant 5.000000e-01 : f32
    %59 = vector.broadcast %cst_22 : f32 to vector<8x64xf32>
    %60 = arith.mulf %59, %58 : vector<8x64xf32>
    %c24_23 = arith.constant 24 : index
    %c0_24 = arith.constant 0 : index
    %61 = vector.load %arg2[%c24_23, %c0_24] : memref<72x64xf32, #tpu.memory_space<vmem>>, vector<8x64xf32>
    tpu.vector_store %arg2[%c24_23, %c0_24], %60 {strides = array<i32>} : memref<72x64xf32, #tpu.memory_space<vmem>>, vector<8x64xf32>,
    %c27 = arith.constant 27 : index
    %c0_25 = arith.constant 0 : index
    %62 = vector.load %arg1[%c27, %c0_25] : memref<40x64xf32, #tpu.memory_space<vmem>>, vector<1x64xf32>
    %c35 = arith.constant 35 : index
    %c0_26 = arith.constant 0 : index
    %63 = vector.load %arg1[%c35, %c0_26] : memref<40x64xf32, #tpu.memory_space<vmem>>, vector<1x64xf32>
    %64 = vector.broadcast %62 : vector<1x64xf32> to vector<8x64xf32>
    %65 = arith.subf %64, %2 : vector<8x64xf32>
    %66 = arith.mulf %65, %65 : vector<8x64xf32>
    %67 = vector.broadcast %63 : vector<1x64xf32> to vector<8x64xf32>
    %68 = arith.subf %67, %3 : vector<8x64xf32>
    %69 = arith.mulf %68, %68 : vector<8x64xf32>
    %70 = arith.addf %66, %69 : vector<8x64xf32>
    %cst_27 = arith.constant 1.000000e-30 : f32
    %71 = vector.broadcast %cst_27 : f32 to vector<8x64xf32>
    %72 = arith.maximumf %70, %71 : vector<8x64xf32>
    %73 = math.log %72 : vector<8x64xf32>
    %cst_28 = arith.constant 5.000000e-01 : f32
    %74 = vector.broadcast %cst_28 : f32 to vector<8x64xf32>
    %75 = arith.mulf %74, %73 : vector<8x64xf32>
    %c32_29 = arith.constant 32 : index
    %c0_30 = arith.constant 0 : index
    %76 = vector.load %arg2[%c32_29, %c0_30] : memref<72x64xf32, #tpu.memory_space<vmem>>, vector<8x64xf32>
    tpu.vector_store %arg2[%c32_29, %c0_30], %75 {strides = array<i32>} : memref<72x64xf32, #tpu.memory_space<vmem>>, vector<8x64xf32>,
    %c28 = arith.constant 28 : index
    %c0_31 = arith.constant 0 : index
    %77 = vector.load %arg1[%c28, %c0_31] : memref<40x64xf32, #tpu.memory_space<vmem>>, vector<1x64xf32>
    %c36 = arith.constant 36 : index
    %c0_32 = arith.constant 0 : index
    %78 = vector.load %arg1[%c36, %c0_32] : memref<40x64xf32, #tpu.memory_space<vmem>>, vector<1x64xf32>
    %79 = vector.broadcast %77 : vector<1x64xf32> to vector<8x64xf32>
    %80 = arith.subf %79, %2 : vector<8x64xf32>
    %81 = arith.mulf %80, %80 : vector<8x64xf32>
    %82 = vector.broadcast %78 : vector<1x64xf32> to vector<8x64xf32>
    %83 = arith.subf %82, %3 : vector<8x64xf32>
    %84 = arith.mulf %83, %83 : vector<8x64xf32>
    %85 = arith.addf %81, %84 : vector<8x64xf32>
    %cst_33 = arith.constant 1.000000e-30 : f32
    %86 = vector.broadcast %cst_33 : f32 to vector<8x64xf32>
    %87 = arith.maximumf %85, %86 : vector<8x64xf32>
    %88 = math.log %87 : vector<8x64xf32>
    %cst_34 = arith.constant 5.000000e-01 : f32
    %89 = vector.broadcast %cst_34 : f32 to vector<8x64xf32>
    %90 = arith.mulf %89, %88 : vector<8x64xf32>
    %c40 = arith.constant 40 : index
    %c0_35 = arith.constant 0 : index
    %91 = vector.load %arg2[%c40, %c0_35] : memref<72x64xf32, #tpu.memory_space<vmem>>, vector<8x64xf32>
    tpu.vector_store %arg2[%c40, %c0_35], %90 {strides = array<i32>} : memref<72x64xf32, #tpu.memory_space<vmem>>, vector<8x64xf32>,
    %c29 = arith.constant 29 : index
    %c0_36 = arith.constant 0 : index
    %92 = vector.load %arg1[%c29, %c0_36] : memref<40x64xf32, #tpu.memory_space<vmem>>, vector<1x64xf32>
    %c37 = arith.constant 37 : index
    %c0_37 = arith.constant 0 : index
    %93 = vector.load %arg1[%c37, %c0_37] : memref<40x64xf32, #tpu.memory_space<vmem>>, vector<1x64xf32>
    %94 = vector.broadcast %92 : vector<1x64xf32> to vector<8x64xf32>
    %95 = arith.subf %94, %2 : vector<8x64xf32>
    %96 = arith.mulf %95, %95 : vector<8x64xf32>
    %97 = vector.broadcast %93 : vector<1x64xf32> to vector<8x64xf32>
    %98 = arith.subf %97, %3 : vector<8x64xf32>
    %99 = arith.mulf %98, %98 : vector<8x64xf32>
    %100 = arith.addf %96, %99 : vector<8x64xf32>
    %cst_38 = arith.constant 1.000000e-30 : f32
    %101 = vector.broadcast %cst_38 : f32 to vector<8x64xf32>
    %102 = arith.maximumf %100, %101 : vector<8x64xf32>
    %103 = math.log %102 : vector<8x64xf32>
    %cst_39 = arith.constant 5.000000e-01 : f32
    %104 = vector.broadcast %cst_39 : f32 to vector<8x64xf32>
    %105 = arith.mulf %104, %103 : vector<8x64xf32>
    %c48 = arith.constant 48 : index
    %c0_40 = arith.constant 0 : index
    %106 = vector.load %arg2[%c48, %c0_40] : memref<72x64xf32, #tpu.memory_space<vmem>>, vector<8x64xf32>
    tpu.vector_store %arg2[%c48, %c0_40], %105 {strides = array<i32>} : memref<72x64xf32, #tpu.memory_space<vmem>>, vector<8x64xf32>,
    %c30 = arith.constant 30 : index
    %c0_41 = arith.constant 0 : index
    %107 = vector.load %arg1[%c30, %c0_41] : memref<40x64xf32, #tpu.memory_space<vmem>>, vector<1x64xf32>
    %c38 = arith.constant 38 : index
    %c0_42 = arith.constant 0 : index
    %108 = vector.load %arg1[%c38, %c0_42] : memref<40x64xf32, #tpu.memory_space<vmem>>, vector<1x64xf32>
    %109 = vector.broadcast %107 : vector<1x64xf32> to vector<8x64xf32>
    %110 = arith.subf %109, %2 : vector<8x64xf32>
    %111 = arith.mulf %110, %110 : vector<8x64xf32>
    %112 = vector.broadcast %108 : vector<1x64xf32> to vector<8x64xf32>
    %113 = arith.subf %112, %3 : vector<8x64xf32>
    %114 = arith.mulf %113, %113 : vector<8x64xf32>
    %115 = arith.addf %111, %114 : vector<8x64xf32>
    %cst_43 = arith.constant 1.000000e-30 : f32
    %116 = vector.broadcast %cst_43 : f32 to vector<8x64xf32>
    %117 = arith.maximumf %115, %116 : vector<8x64xf32>
    %118 = math.log %117 : vector<8x64xf32>
    %cst_44 = arith.constant 5.000000e-01 : f32
    %119 = vector.broadcast %cst_44 : f32 to vector<8x64xf32>
    %120 = arith.mulf %119, %118 : vector<8x64xf32>
    %c56 = arith.constant 56 : index
    %c0_45 = arith.constant 0 : index
    %121 = vector.load %arg2[%c56, %c0_45] : memref<72x64xf32, #tpu.memory_space<vmem>>, vector<8x64xf32>
    tpu.vector_store %arg2[%c56, %c0_45], %120 {strides = array<i32>} : memref<72x64xf32, #tpu.memory_space<vmem>>, vector<8x64xf32>,
    %c31 = arith.constant 31 : index
    %c0_46 = arith.constant 0 : index
    %122 = vector.load %arg1[%c31, %c0_46] : memref<40x64xf32, #tpu.memory_space<vmem>>, vector<1x64xf32>
    %c39 = arith.constant 39 : index
    %c0_47 = arith.constant 0 : index
    %123 = vector.load %arg1[%c39, %c0_47] : memref<40x64xf32, #tpu.memory_space<vmem>>, vector<1x64xf32>
    %124 = vector.broadcast %122 : vector<1x64xf32> to vector<8x64xf32>
    %125 = arith.subf %124, %2 : vector<8x64xf32>
    %126 = arith.mulf %125, %125 : vector<8x64xf32>
    %127 = vector.broadcast %123 : vector<1x64xf32> to vector<8x64xf32>
    %128 = arith.subf %127, %3 : vector<8x64xf32>
    %129 = arith.mulf %128, %128 : vector<8x64xf32>
    %130 = arith.addf %126, %129 : vector<8x64xf32>
    %cst_48 = arith.constant 1.000000e-30 : f32
    %131 = vector.broadcast %cst_48 : f32 to vector<8x64xf32>
    %132 = arith.maximumf %130, %131 : vector<8x64xf32>
    %133 = math.log %132 : vector<8x64xf32>
    %cst_49 = arith.constant 5.000000e-01 : f32
    %134 = vector.broadcast %cst_49 : f32 to vector<8x64xf32>
    %135 = arith.mulf %134, %133 : vector<8x64xf32>
    %c64 = arith.constant 64 : index
    %c0_50 = arith.constant 0 : index
    %136 = vector.load %arg2[%c64, %c0_50] : memref<72x64xf32, #tpu.memory_space<vmem>>, vector<8x64xf32>
    tpu.vector_store %arg2[%c64, %c0_50], %135 {strides = array<i32>} : memref<72x64xf32, #tpu.memory_space<vmem>>, vector<8x64xf32>,
    return
  }
  func.func @transform_0(%arg0: i32) -> (i32, i32) {
    %c0_i32 = arith.constant 0 : i32
    %c0_i32_0 = arith.constant 0 : i32
    return %c0_i32, %arg0 : i32, i32
  }
  func.func @transform_1(%arg0: i32) -> (i32, i32) {
    %c0_i32 = arith.constant 0 : i32
    %c0_i32_0 = arith.constant 0 : i32
    return %c0_i32, %arg0 : i32, i32
  }
}

</mosaic_0001>

<bundles_post_ra>
// kernel: tpu_custom_call.1
= control target key start
LH: loop header
LB: loop body
LE: loop exit
PB: predicated region body
PF: predicated region fallthrough
CT: control target
= control target key end

     0   :  { %6 = vsyncpa [#allocation3], 0  ;;  %s273_s6 = smov [#allocation2]   ;;  %s356_s0 = inlined_call_operand.hbm [shape: f32[40,64], index: 0, kind: input, shape index: {}]   ;;  %s357_s1 = inlined_call_operand.vmem [shape: f32[72,64], index: 1, kind: output, shape index: {}]  }
   0x1   :  { %s12_s7 = sshll.u32 %s273_s6, 4  ;;  %s249_s10 = scalar_lea.hbm %s356_s0, 640  ;;  %s13_s7 = int_to_ptr.vmem [resolvable:$true] %s12_s7 }
   0x2   :  { %p250_p0 = scmp.ne.s32.totalorder %s356_s0, %s249_s10  ;;  %p253_p1 = scmp.lt.u32.totalorder %s249_s10, %s356_s0 }
   0x4   :  { %p255_p2 = pnand %p253_p1, %p250_p0 }
   0x6   :  { %258 = shalt.err (!%p255_p2)
}
   0x7   :  { %s259_s15 = scalar_lea.vmem %s13_s7, 640  ;;  %p264_p4 = scmp.lt.s32.totalorder %s13_s7, %s13_s7 }
   0x8   :  { %p260_p3 = scmp.ne.s32.totalorder %s13_s7, %s259_s15  ;;  %p265_p5 = scmp.lt.s32.totalorder %s259_s15, %s259_s15 }
   0xa   :  { %p266_p6 = por %p265_p5, %p264_p4 }
   0xc   :  { %p267_p7 = pnand %p266_p6, %p260_p3 }
   0xe   :  { %270 = shalt.err (!%p267_p7)
}
   0xf   :  { %s274_s16 = smov 128   ;;  %s275_s17 = smov 8  }
  0x10   :  { %18 = dma.hbm_to_vmem [thread:$0]  %s356_s0, 640, %s13_s7, [#allocation3], %s274_s16, %s274_s16, %s275_s17  }
  0x11   :  { %271 = dma.done.wait [#allocation3], 640  }
  0x12   :  { %272 = vsyncadd [#allocation3], 4294966656  ;;  %v210_v0 = vld [vmem:[#allocation2] ss:$0 sm:$0xff]  ;;  %v211_v1 = vld [vmem:[#allocation2 + $0x1] ss:$0 sm:$0xff] }
  0x13   :  { %v298_v2 = vld [vmem:[#allocation2 + $0x8] sm:$0xff]  ;;  %v300_v3 = vld [vmem:[#allocation2 + $0x10] sm:$0xff]  ;;  %v212_v5 = vld [vmem:[#allocation2 + $0x18] ss:$0 sm:$0xff]  ;;  %vm43_vm0 = vcmask 523264  }
  0x14   :  { %v30_v4 = vsub.f32 %v210_v0, %v298_v2  ;;  %v213_v6 = vld [vmem:[#allocation2 + $0x20] ss:$0 sm:$0xff]  ;;  %v36_v7 = vsub.f32 %v211_v1, %v300_v3  ;;  %v51_v8 = vsub.f32 %v212_v5, %v298_v2  ;;  %v214_v10 = vld [vmem:[#allocation2 + $0x19] ss:$0 sm:$0xff]  ;;  %v215_v11 = vld [vmem:[#allocation2 + $0x21] ss:$0 sm:$0xff] }
  0x15   :  { %v57_v9 = vsub.f32 %v213_v6, %v300_v3  ;;  %v216_v12 = vld [vmem:[#allocation2 + $0x1a] ss:$0 sm:$0xff]  ;;  %v71_v14 = vsub.f32 %v214_v10, %v298_v2  ;;  %v77_v15 = vsub.f32 %v215_v11, %v300_v3  ;;  %v217_v16 = vld [vmem:[#allocation2 + $0x22] ss:$0 sm:$0xff]  ;;  %v218_v18 = vld [vmem:[#allocation2 + $0x1b] ss:$0 sm:$0xff] }
  0x16   :  { %v31_v13 = vmul.f32 %v30_v4, %v30_v4  ;;  %v91_v17 = vsub.f32 %v216_v12, %v298_v2  ;;  %v219_v19 = vld [vmem:[#allocation2 + $0x23] ss:$0 sm:$0xff]  ;;  %v37_v20 = vmul.f32 %v36_v7, %v36_v7  ;;  %v52_v21 = vmul.f32 %v51_v8, %v51_v8  ;;  %v220_v24 = vld [vmem:[#allocation2 + $0x1c] ss:$0 sm:$0xff]  ;;  %v221_v25 = vld [vmem:[#allocation2 + $0x24] ss:$0 sm:$0xff] }
  0x17   :  { %v58_v22 = vmul.f32 %v57_v9, %v57_v9  ;;  %v97_v23 = vsub.f32 %v217_v16, %v300_v3  ;;  %v72_v26 = vmul.f32 %v71_v14, %v71_v14  ;;  %v78_v27 = vmul.f32 %v77_v15, %v77_v15  ;;  %v222_v34 = vld [vmem:[#allocation2 + $0x1d] ss:$0 sm:$0xff]  ;;  %v223_v39 = vld [vmem:[#allocation2 + $0x25] ss:$0 sm:$0xff]  ;;  %v224_v44 = vld [vmem:[#allocation2 + $0x1e] ss:$0 sm:$0xff] }
  0x18   :  { %v92_v28 = vmul.f32 %v91_v17, %v91_v17  ;;  %v111_v29 = vsub.f32 %v218_v18, %v298_v2  ;;  %v38_v30 = vadd.f32 %v37_v20, %v31_v13  ;;  %v117_v33 = vsub.f32 %v219_v19, %v300_v3  ;;  %v225_v49 = vld [vmem:[#allocation2 + $0x26] ss:$0 sm:$0xff]  ;;  %v226_v53 = vld [vmem:[#allocation2 + $0x1f] ss:$0 sm:$0xff]  ;;  %v227_v57 = vld [vmem:[#allocation2 + $0x27] ss:$0 sm:$0xff] }
  0x19   :  { %v59_v31 = vadd.f32 %v58_v22, %v52_v21  ;;  %v98_v32 = vmul.f32 %v97_v23, %v97_v23  ;;  %v79_v35 = vadd.f32 %v78_v27, %v72_v26  ;;  %v131_v37 = vsub.f32 %v220_v24, %v298_v2 }
  0x1a   :  { %v112_v36 = vmul.f32 %v111_v29, %v111_v29  ;;  %v137_v38 = vsub.f32 %v221_v25, %v300_v3  ;;  %v39_v40 = vmax.f32 %v38_v30, 1e-30  ;;  %v118_v43 = vmul.f32 %v117_v33, %v117_v33 }
  0x1b   :  { %v60_v41 = vmax.f32 %v59_v31, 1e-30  ;;  %v99_v42 = vadd.f32 %v98_v32, %v92_v28  ;;  %v80_v45 = vmax.f32 %v79_v35, 1e-30  ;;  %v132_v46 = vmul.f32 %v131_v37, %v131_v37 }
  0x1c   :  { %v138_v47 = vmul.f32 %v137_v38, %v137_v38  ;;  %v151_v48 = vsub.f32 %v222_v34, %v298_v2  ;;  %231 = vlog2.f32 %v39_v40  ;;  %v119_v51 = vadd.f32 %v118_v43, %v112_v36 }
  0x1d   :  { %v100_v50 = vmax.f32 %v99_v42, 1e-30  ;;  %v157_v52 = vsub.f32 %v223_v39, %v300_v3  ;;  %233 = vlog2.f32 %v60_v41  ;;  %v171_v56 = vsub.f32 %v224_v44, %v298_v2 }
  0x1e   :  { %v139_v54 = vadd.f32 %v138_v47, %v132_v46  ;;  %v152_v55 = vmul.f32 %v151_v48, %v151_v48  ;;  %235 = vlog2.f32 %v80_v45  ;;  %v120_v58 = vmax.f32 %v119_v51, 1e-30 }
  0x1f   :  { %v158_v59 = vmul.f32 %v157_v52, %v157_v52  ;;  %v177_v60 = vsub.f32 %v225_v49, %v300_v3  ;;  %237 = vlog2.f32 %v100_v50  ;;  %v172_v62 = vmul.f32 %v171_v56, %v171_v56 }
  0x20   :  { %v140_v61 = vmax.f32 %v139_v54, 1e-30  ;;  %v191_v63 = vsub.f32 %v226_v53, %v298_v2  ;;  %239 = vlog2.f32 %v120_v58  ;;  %v197_v4 = vsub.f32 %v227_v57, %v300_v3 }
  0x21   :  { %v159_v0 = vadd.f32 %v158_v59, %v152_v55  ;;  %v178_v1 = vmul.f32 %v177_v60, %v177_v60 }
  0x22   :  { %241 = vlog2.f32 %v140_v61  ;;  %v192_v5 = vmul.f32 %v191_v63, %v191_v63  ;;  %v198_v8 = vmul.f32 %v197_v4, %v197_v4 }
  0x23   :  { %v160_v6 = vmax.f32 %v159_v0, 1e-30  ;;  %v179_v7 = vadd.f32 %v178_v1, %v172_v62 }
  0x24   :  { %v199_v10 = vadd.f32 %v198_v8, %v192_v5 }
  0x25   :  { %243 = vlog2.f32 %v160_v6  ;;  %v180_v9 = vmax.f32 %v179_v7, 1e-30 }
  0x26   :  { %v232_v11 = vpop.eup %231  ;;  %v200_v12 = vmax.f32 %v199_v10, 1e-30 }
  0x27   :  { %245 = vlog2.f32 %v180_v9  ;;  %v234_v13 = vpop.eup %233  ;;  %v41_v14 = vmul.f32 0.6931472, %v232_v11 }
  0x28   :  { %v236_v15 = vpop.eup %235  ;;  %v62_v2 = vmul.f32 0.6931472, %v234_v13  ;;  %247 = vlog2.f32 %v200_v12 }
  0x29   :  { %v238_v16 = vpop.eup %237  ;;  %v42_v17 = vmul.f32 0.5, %v41_v14  ;;  %v82_v3 = vmul.f32 0.6931472, %v236_v15 }
  0x2a   :  { %v240_v18 = vpop.eup %239  ;;  %v63_v19 = vmul.f32 0.5, %v62_v2  ;;  %v102_v20 = vmul.f32 0.6931472, %v238_v16 }
  0x2b   :  { %44 = vst.msk [vmem:[%s357_s1] sm:$0xff] %vm43_vm0, %v42_v17  ;;  %v83_v22 = vmul.f32 0.5, %v82_v3  ;;  %v122_v23 = vmul.f32 0.6931472, %v240_v18 }
  0x2c   :  { %v242_v21 = vpop.eup %241  ;;  %64 = vst.msk [vmem:[%s357_s1 + $0x8] sm:$0xff] %vm43_vm0, %v63_v19  ;;  %v103_v24 = vmul.f32 0.5, %v102_v20 }
  0x2d   :  { %v142_v25 = vmul.f32 0.6931472, %v242_v21  ;;  %84 = vst.msk [vmem:[%s357_s1 + $0x10] sm:$0xff] %vm43_vm0, %v83_v22  ;;  %v123_v26 = vmul.f32 0.5, %v122_v23 }
  0x2e   :  { %104 = vst.msk [vmem:[%s357_s1 + $0x18] sm:$0xff] %vm43_vm0, %v103_v24 }
  0x2f   :  { %v244_v27 = vpop.eup %243  ;;  %v143_v28 = vmul.f32 0.5, %v142_v25  ;;  %124 = vst.msk [vmem:[%s357_s1 + $0x20] sm:$0xff] %vm43_vm0, %v123_v26 }
  0x30   :  { %v162_v29 = vmul.f32 0.6931472, %v244_v27 }
  0x31   :  { %v246_v30 = vpop.eup %245  ;;  %144 = vst.msk [vmem:[%s357_s1 + $0x28] sm:$0xff] %vm43_vm0, %v143_v28 }
  0x32   :  { %v163_v31 = vmul.f32 0.5, %v162_v29  ;;  %v182_v32 = vmul.f32 0.6931472, %v246_v30  ;;  %v248_v33 = vpop.eup %247 }
  0x33   :  { %v202_v35 = vmul.f32 0.6931472, %v248_v33 }
  0x34   :  { %164 = vst.msk [vmem:[%s357_s1 + $0x30] sm:$0xff] %vm43_vm0, %v163_v31  ;;  %v183_v34 = vmul.f32 0.5, %v182_v32 }
  0x35   :  { %v203_v36 = vmul.f32 0.5, %v202_v35 }
  0x36   :  { %184 = vst.msk [vmem:[%s357_s1 + $0x38] sm:$0xff] %vm43_vm0, %v183_v34 }
  0x37   :  { %204 = vst.msk [vmem:[%s357_s1 + $0x40] sm:$0xff] %vm43_vm0, %v203_v36 }
  0x38   :  { %209 = vsyncpa [#allocation3], 1 }

</bundles_post_ra>
